<compile_context>
chip_gen: v7x
topology: tpu7x:2x2x1
jax: 0.10.0
libtpu: 0.0.40
codegen_flags: <defaults>
</compile_context>

<pallas_src>
import jax
import jax.numpy as jnp
from jax.experimental import pallas as pl
from jax.experimental.pallas import tpu as pltpu

_LANE = 128
_SUBLANE = 8


def _round_up(x: int, m: int) -> int:
    return ((x + m - 1) // m) * m


def _vmem_capacity_bytes() -> int:
    try:
        return int(pltpu.get_tpu_info().vmem_capacity_bytes)
    except Exception:
        # Off-TPU tracing / older runtimes: assume the smallest (v7x-sized) VMEM.
        return 64 * 1024 * 1024


def _plan_tiles(N, C_in, C_out, L, x_itemsize, out_itemsize):
    """Pick (batch_block, L_tile, vmem_cap) so the double-buffered x/out blocks fill a
    per-generation VMEM budget without overflowing v7x's 64 MiB (or v5e's smaller scoped
    default once vmem_limit_bytes is raised)."""
    vmem_cap = _vmem_capacity_bytes()
    budget = max(2 * 1024 * 1024, vmem_cap // 4)      # headroom for weights/bias/scratch

    cin_rows = _round_up(C_in, _SUBLANE)              # sublane padding of 2nd-minor dims
    cout_rows = _round_up(C_out, _SUBLANE)
    per_col = 2 * (cin_rows * x_itemsize + cout_rows * out_itemsize)   # x2: double-buffered

    max_cols = min(65536, max(_LANE, (budget // per_col) // _LANE * _LANE))
    if L <= max_cols:
        tile_l = L                                    # full-extent L block (always legal)
    else:
        tile_l = max_cols                             # multiple of 128; ragged tail via cdiv

    # When one L tile already covers L, block several batch rows per step so per-step
    # HBM volume stays in the multi-MiB range for large-N / small-L problems.
    bn = 1
    if tile_l >= L:
        bn = int(max(1, min(256, N, budget // (per_col * tile_l))))
        if bn >= N and N > 1:
            bn = (N + 1) // 2                         # keep >=2 grid steps (2 TCs on v7x)
    return bn, tile_l, vmem_cap


def _feature_conv_kernel(x_ref, w_ref, b_ref, o_ref):
    # x_ref : (BN, C_in, TILE_L)   input slab in the caller's dtype (cast in-kernel)
    # w_ref : (C_out, C_in)        conv weight with both BNs folded in (grid-resident)
    # b_ref : (C_out, 1)           folded bias (grid-resident)
    # o_ref : (BN, C_out, TILE_L)  lane-dense output block, stored in the caller's dtype
    w = w_ref[...]
    b = b_ref[...]
    if x_ref.shape[0] == 1:
        # Common case (large L): plain 2D matmul, no batch dim.
        x = x_ref[0].astype(jnp.float32)                               # (C_in, TL)
        y = jnp.dot(w, x, preferred_element_type=jnp.float32)          # (C_out, TL)
        o_ref[0] = jnp.maximum(y + b, 0.0).astype(o_ref.dtype)
    else:
        # Small-L case: several batch rows per step; batch is a true dot_general batch
        # dim so the result comes out as (BN, C_out, TL) with no transpose/relayout.
        x = x_ref[...].astype(jnp.float32)                             # (BN, C_in, TL)
        w_b = jnp.broadcast_to(w, (x.shape[0],) + w.shape)             # tiny (BN, C_out, C_in)
        y = jax.lax.dot_general(
            w_b, x,
            dimension_numbers=(((2,), (1,)), ((0,), (0,))),
            preferred_element_type=jnp.float32)                        # (BN, C_out, TL)
        o_ref[...] = jnp.maximum(y + b[None, :, :], 0.0).astype(o_ref.dtype)


def feature_conv_pallas(x_ncl, w_oc_ic, bn1, bn2, eps=1e-5):
    """x_ncl: (N, C_in, L).  w_oc_ic: (C_out, C_in) Conv1d(k=1, bias=False) weight.
    bn1/bn2: dicts of per-channel gamma/beta/mean/var (eval-mode running statistics).
    Returns (N, C_out, L) = ReLU(BN2(Conv1d(BN1(x)))) in x_ncl's dtype."""
    N, C_in, L = x_ncl.shape
    C_out = w_oc_ic.shape[0]
    out_dtype = x_ncl.dtype

    # Fold BOTH BatchNorms into the conv weight and a single bias (eval-mode semantics):
    #   BN1: xn = x*s1 + b1 ; Conv: y = W @ xn ; BN2: z = y*s2 + b2
    #   =>  z = (s2[:,None] * W * s1[None,:]) @ x  +  ((W @ b1) * s2 + b2)
    s1 = bn1["gamma"] * jax.lax.rsqrt(bn1["var"].astype(jnp.float32) + eps)
    b1 = bn1["beta"] - bn1["mean"] * s1
    s2 = bn2["gamma"] * jax.lax.rsqrt(bn2["var"].astype(jnp.float32) + eps)
    b2 = bn2["beta"] - bn2["mean"] * s2
    w32 = w_oc_ic.astype(jnp.float32)
    w_fold = ((w32 * s1[None, :]) * s2[:, None]).astype(jnp.float32)   # (C_out, C_in)
    b_fold = ((w32 @ b1) * s2 + b2).reshape(C_out, 1).astype(jnp.float32)  # (C_out, 1)

    x_item = jnp.dtype(x_ncl.dtype).itemsize
    o_item = jnp.dtype(out_dtype).itemsize
    bn_blk, tile_l, vmem_cap = _plan_tiles(N, C_in, C_out, L, x_item, o_item)

    grid = (pl.cdiv(N, bn_blk), pl.cdiv(L, tile_l))

    cost = pl.CostEstimate(
        flops=2 * N * C_out * C_in * L,
        transcendentals=0,
        bytes_accessed=N * L * (C_in * x_item + C_out * o_item)
        + (C_out * C_in + C_out) * 4,
    )

    return pl.pallas_call(
        _feature_conv_kernel,
        out_shape=jax.ShapeDtypeStruct((N, C_out, L), out_dtype),
        grid=grid,
        in_specs=[
            pl.BlockSpec((bn_blk, C_in, tile_l), lambda n, l: (n, 0, l)),
            # Folded weight / bias stay resident across all grid steps.
            pl.BlockSpec((C_out, C_in), lambda n, l: (0, 0)),
            pl.BlockSpec((C_out, 1), lambda n, l: (0, 0)),
        ],
        out_specs=pl.BlockSpec((bn_blk, C_out, tile_l), lambda n, l: (n, 0, l)),
        compiler_params=pltpu.CompilerParams(
            dimension_semantics=("parallel", "parallel"),
            vmem_limit_bytes=int(min(vmem_cap, max(32 * 1024 * 1024, vmem_cap // 2))),
        ),
        cost_estimate=cost,
    )(x_ncl, w_fold, b_fold)


def _reference(x_ncl, w_oc_ic, bn1, bn2, eps=1e-5):
    # Pure-JAX reference of the same eval-mode forward pass (NCL layout, f32).
    x = x_ncl.astype(jnp.float32)
    xn = (x - bn1["mean"][None, :, None]) / jnp.sqrt(bn1["var"][None, :, None] + eps)
    xn = xn * bn1["gamma"][None, :, None] + bn1["beta"][None, :, None]
    y = jnp.einsum("oc,ncl->nol", w_oc_ic.astype(jnp.float32), xn)
    y = (y - bn2["mean"][None, :, None]) / jnp.sqrt(bn2["var"][None, :, None] + eps)
    y = y * bn2["gamma"][None, :, None] + bn2["beta"][None, :, None]
    return jnp.maximum(y, 0.0)


def _make_inputs(key, N, C_in, C_out, L):
    keys = jax.random.split(key, 10)
    x = jax.random.normal(keys[0], (N, C_in, L), dtype=jnp.float32)
    # Conv1d(kernel_size=1, bias=False) weight: (C_out, C_in, 1) -> squeeze k dim.
    w = 0.1 * jax.random.normal(keys[1], (C_out, C_in), dtype=jnp.float32)
    bn1 = dict(
        gamma=1.0 + 0.1 * jax.random.normal(keys[2], (C_in,), dtype=jnp.float32),
        beta=0.1 * jax.random.normal(keys[3], (C_in,), dtype=jnp.float32),
        mean=0.1 * jax.random.normal(keys[4], (C_in,), dtype=jnp.float32),
        var=jnp.abs(1.0 + 0.1 * jax.random.normal(keys[5], (C_in,), dtype=jnp.float32)),
    )
    bn2 = dict(
        gamma=1.0 + 0.1 * jax.random.normal(keys[6], (C_out,), dtype=jnp.float32),
        beta=0.1 * jax.random.normal(keys[7], (C_out,), dtype=jnp.float32),
        mean=0.1 * jax.random.normal(keys[8], (C_out,), dtype=jnp.float32),
        var=jnp.abs(1.0 + 0.1 * jax.random.normal(keys[9], (C_out,), dtype=jnp.float32)),
    )
    return x, w, bn1, bn2


if __name__ == "__main__":
    key = jax.random.PRNGKey(0)
    k0, k1, k2 = jax.random.split(key, 3)

    # Main case: FeatureConv(in_chn=4, out_chn=32) on (N=2, C_in=4, L=16).
    x, w, bn1, bn2 = _make_inputs(k0, N=2, C_in=4, C_out=32, L=16)
    out = jax.block_until_ready(feature_conv_pallas(x, w, bn1, bn2))
    ref = _reference(x, w, bn1, bn2)
    assert out.shape == (2, 32, 16)
    assert jnp.allclose(out, ref, atol=1e-5, rtol=1e-5), "mismatch vs reference (main)"

    # Batch-blocked path (small L, several batch rows per grid step).
    x, w, bn1, bn2 = _make_inputs(k1, N=4, C_in=4, C_out=32, L=8)
    out = jax.block_until_ready(feature_conv_pallas(x, w, bn1, bn2))
    ref = _reference(x, w, bn1, bn2)
    assert out.shape == (4, 32, 8)
    assert jnp.allclose(out, ref, atol=1e-5, rtol=1e-5), "mismatch vs reference (batched)"

    # Ragged L (not a multiple of 128): full-extent lane block, masked tail lanes.
    x, w, bn1, bn2 = _make_inputs(k2, N=2, C_in=4, C_out=32, L=200)
    out = jax.block_until_ready(feature_conv_pallas(x, w, bn1, bn2))
    ref = _reference(x, w, bn1, bn2)
    assert out.shape == (2, 32, 200)
    assert jnp.allclose(out, ref, atol=1e-5, rtol=1e-5), "mismatch vs reference (ragged L)"

    print("KERNEL_OK")
</pallas_src>

<mosaic_0001>
module attributes {stable_mosaic.version = 11 : i64} {
  func.func @_feature_conv_kernel(%arg0: i32, %arg1: i32, %arg2: memref<1x4x16xf32, #tpu.memory_space<vmem>>, %arg3: memref<32x4xf32, #tpu.memory_space<vmem>>, %arg4: memref<32x1xf32, #tpu.memory_space<vmem>>, %arg5: memref<1x32x16xf32, #tpu.memory_space<vmem>>) attributes {dimension_semantics = [#tpu.dimension_semantics<parallel>, #tpu.dimension_semantics<parallel>], iteration_bounds = array<i64: 2, 1>, scalar_prefetch = 0 : i64, scratch_operands = 0 : i64, tpu.core_type = #tpu.core_type<tc>, window_params = [{transform_indices = @transform_0, window_bounds = array<i64: 1, 4, 16>}, {pipeline_mode = #tpu.pipeline_mode<synchronous>, transform_indices = @transform_1, window_bounds = array<i64: 32, 4>}, {pipeline_mode = #tpu.pipeline_mode<synchronous>, transform_indices = @transform_2, window_bounds = array<i64: 32, 1>}, {transform_indices = @transform_3, window_bounds = array<i64: 1, 32, 16>}]} {
    %c0 = arith.constant 0 : index
    %c0_0 = arith.constant 0 : index
    %0 = vector.load %arg3[%c0, %c0_0] : memref<32x4xf32, #tpu.memory_space<vmem>>, vector<32x4xf32>
    %c0_1 = arith.constant 0 : index
    %c0_2 = arith.constant 0 : index
    %1 = vector.load %arg4[%c0_1, %c0_2] : memref<32x1xf32, #tpu.memory_space<vmem>>, vector<32x1xf32>
    %c0_3 = arith.constant 0 : index
    %c0_4 = arith.constant 0 : index
    %c0_5 = arith.constant 0 : index
    %2 = vector.load %arg2[%c0_3, %c0_4, %c0_5] : memref<1x4x16xf32, #tpu.memory_space<vmem>>, vector<1x4x16xf32>
    %3 = vector.shape_cast %2 : vector<1x4x16xf32> to vector<4x16xf32>
    %cst = arith.constant dense<0.000000e+00> : vector<32x16xf32>
    %4 = tpu.matmul %0, %3, %cst {dimension_numbers = #tpu.dot_dimension_numbers<[1], [0], [0], [1], [0, 0, 1, 1], [], []>} : vector<32x4xf32>, vector<4x16xf32>, vector<32x16xf32> -> vector<32x16xf32>
    %5 = vector.broadcast %1 : vector<32x1xf32> to vector<32x16xf32>
    %6 = arith.addf %4, %5 : vector<32x16xf32>
    %cst_6 = arith.constant 0.000000e+00 : f32
    %7 = vector.broadcast %cst_6 : f32 to vector<32x16xf32>
    %8 = arith.maximumf %6, %7 : vector<32x16xf32>
    %c0_7 = arith.constant 0 : index
    %c0_8 = arith.constant 0 : index
    %c0_9 = arith.constant 0 : index
    %9 = vector.load %arg5[%c0_7, %c0_8, %c0_9] : memref<1x32x16xf32, #tpu.memory_space<vmem>>, vector<1x32x16xf32>
    %10 = vector.shape_cast %9 : vector<1x32x16xf32> to vector<32x16xf32>
    %11 = vector.shape_cast %8 : vector<32x16xf32> to vector<1x32x16xf32>
    tpu.vector_store %arg5[%c0_7, %c0_8, %c0_9], %11 {strides = array<i32>} : memref<1x32x16xf32, #tpu.memory_space<vmem>>, vector<1x32x16xf32>,
    return
  }
  func.func @transform_0(%arg0: i32, %arg1: i32) -> (i32, i32, i32) {
    %c0_i32 = arith.constant 0 : i32
    %c0_i32_0 = arith.constant 0 : i32
    return %arg0, %c0_i32, %arg1 : i32, i32, i32
  }
  func.func @transform_1(%arg0: i32, %arg1: i32) -> (i32, i32) {
    %c0_i32 = arith.constant 0 : i32
    %c0_i32_0 = arith.constant 0 : i32
    %c0_i32_1 = arith.constant 0 : i32
    return %c0_i32, %c0_i32_0 : i32, i32
  }
  func.func @transform_2(%arg0: i32, %arg1: i32) -> (i32, i32) {
    %c0_i32 = arith.constant 0 : i32
    %c0_i32_0 = arith.constant 0 : i32
    %c0_i32_1 = arith.constant 0 : i32
    return %c0_i32, %c0_i32_0 : i32, i32
  }
  func.func @transform_3(%arg0: i32, %arg1: i32) -> (i32, i32, i32) {
    %c0_i32 = arith.constant 0 : i32
    %c0_i32_0 = arith.constant 0 : i32
    return %arg0, %c0_i32, %arg1 : i32, i32, i32
  }
}

</mosaic_0001>

<bundles_post_ra>
// kernel: tpu_custom_call.1
= control target key start
LH: loop header
LB: loop body
LE: loop exit
PB: predicated region body
PF: predicated region fallthrough
CT: control target
= control target key end

     0   :  { %s522_s12 = smov 0   ;;  %s524_s13 = smov 0   ;;  %s587_s0 = inlined_call_operand.vmem [shape: f32[2,4,16], index: 0, kind: input, shape index: {}]   ;;  %s588_s1 = inlined_call_operand.vmem [shape: f32[32,4], index: 1, kind: input, shape index: {}]   ;;  %s589_s2 = inlined_call_operand.vmem [shape: f32[32,1], index: 2, kind: input, shape index: {}]   ;;  %s590_s3 = inlined_call_operand.vmem [shape: f32[2,32,16], index: 3, kind: output, shape index: {}]  }
   0x1   :  { %s526_s14 = smov 0  }
   0x2 LB: > { %s25_s15 = sadd.s32 1, %s495_s13  ;;  %p423_p0 = scmp.ge.s32.totalorder %s499_s14, 1  ;;  %s499_s14 = sphi %s526_s14, %s13_s14   ;;  %s495_s13 = sphi %s524_s13, %s592_s13   ;;  %s491_s12 = sphi %s522_s12, %s591_s12  }
   0x3   : > { %p27_p1 = scmp.ge.s32.totalorder %s25_s15, 2  ;;  %p155_p2 = scmp.lt.s32.totalorder %s499_s14, 3 }
   0x5   : > { %s594_s15 = smov (%p27_p1, %s25_s15), 0  ;;  %p156_p3 = pnand %p423_p0, %p155_p2 }
   0x6   : > { %p184_p4 = scmp.lt.s32.totalorder (!%p156_p3), %s491_s12, 1  ;;  %v199_v0 = vld [vmem:[%s588_s1] sm:$0xff] (!%p156_p3)  ;;  %vm228_vm0 = vcmask (!%p156_p3), 31744   ;;  %v201_v1 = vld [vmem:[%s588_s1 + $0x10] sm:$0xff] (!%p156_p3)  ;;  %v501_v4 = vmov (!%p156_p3), 0   ;;  %vm241_vm1 = vcmask (!%p156_p3), 1043456  }
   0x7   : > { %159 = sbr.rel (%p156_p3) target bundleno = 238 (0xee), region = 32  ;;  %442 = vmatprep.mubr.msk.f32.mxu0 (!%p156_p3), %vm228_vm0, %v199_v0  ;;  %445 = vmatprep.mubr.msk.f32.mxu1 (!%p156_p3), %vm228_vm0, %v201_v1  ;;  %v205_v2 = vld [vmem:[%s589_s2 + $0x10] sm:$0xff] (!%p156_p3)  ;;  %v203_v3 = vld [vmem:[%s589_s2] sm:$0xff] (!%p156_p3)  ;;  %v200_v6 = vld [vmem:[%s588_s1 + $0x8] sm:$0xff] (!%p156_p3)  ;;  %vm334_vm2 = vcmask (!%p156_p3), 130048  }
   0x8   : > { %476 = vset.pattern.permute.xlu1 (!%p156_p3), %v501_v4  ;;  %475 = vset.pattern.permute.xlu0 (!%p156_p3), %v501_v4  ;;  %v202_v7 = vld [vmem:[%s588_s1 + $0x18] sm:$0xff] (!%p156_p3)  ;;  %v204_v9 = vld [vmem:[%s589_s2 + $0x8] sm:$0xff] (!%p156_p3) }
   0x9   : > { %220 = vperm.xlu1 (!%p156_p3), %476, %v205_v2   ;;  %210 = vperm.xlu0 (!%p156_p3), %475, %v203_v3   ;;  %v206_v8 = vld [vmem:[%s589_s2 + $0x18] sm:$0xff] (!%p156_p3) }
   0xd   : > { %225 = vperm.xlu1 (!%p156_p3), %476, %v206_v8   ;;  %215 = vperm.xlu0 (!%p156_p3), %475, %v204_v9  }
   0xe   : > { %s596_s12 = smov (!%p184_p4, %s491_s12), 1 }
   0xf   : > { %s424_s24 = sshll.u32 %s596_s12, 2  ;;  %s434_s9 = sshll.u32 %s596_s12, 5 }
  0x10   : > { %s190_s27 = scalar_lea.vmem %s587_s0, %s424_s24  ;;  %s198_s16 = scalar_lea.vmem %s590_s3, %s434_s9 }
  0x11   : > { %v207_v5 = vld [vmem:[%s190_s27] sm:$0xf] }
  0x12   : > { %440 = vmatprep.subr.msk.mxu0 %vm241_vm1, %v207_v5  ;;  %448 = vmatprep.subr.msk.mxu1 %vm241_vm1, %v207_v5 }
  0x13   : > { %441 = vmatpush3.msk.msra.mxu0 %vm241_vm1, %v207_v5  ;;  %449 = vmatpush3.msk.msra.mxu1 %vm241_vm1, %v207_v5 }
  0x14   : > { %443 = vmatmul.mubr.msk.f32.vlgmr.msra.gmra.mrb[0].mxu0 %vm228_vm0, %v200_v6  ;;  %446 = vmatmul.mubr.msk.f32.vlgmr.msra.gmra.mrb[0].mxu1 %vm228_vm0, %v202_v7 }
  0x88   : > { %v221_v10 = vpop.permute.xlu1 %220  ;;  %v211_v11 = vpop.permute.xlu0 %210 }
  0x8c   : > { %v226_v12 = vpop.permute.xlu1 %225  ;;  %v216_v13 = vpop.permute.xlu0 %215 }
  0xe7   : > { %v444_v14 = vpop.f32.mrb[0].mxu0  ;;  %v447_v15 = vpop.f32.mrb[0].mxu1 }
  0xe8   : > { %v317_v16 = vadd.f32 %v444_v14, %v216_v13  ;;  %v327_v17 = vadd.f32 %v447_v15, %v226_v12  ;;  %v311_v18 = vpop.f32.mrb[1].mxu0  ;;  %v321_v19 = vpop.f32.mrb[1].mxu1 }
  0xe9   : > { %v312_v20 = vadd.f32 %v311_v18, %v211_v11  ;;  %v322_v21 = vadd.f32 %v321_v19, %v221_v10 }
  0xea   : > { %v331_v22 = vmax.f32 %v317_v16, 0.0  ;;  %v333_v23 = vmax.f32 %v327_v17, 0.0 }
  0xeb   : > { %v330_v24 = vmax.f32 %v312_v20, 0.0  ;;  %v332_v25 = vmax.f32 %v322_v21, 0.0 }
  0xec   : > { %336 = vst.msk [vmem:[%s198_s16 + $0x8] sm:$0xff] %vm334_vm2, %v331_v22  ;;  %338 = vst.msk [vmem:[%s198_s16 + $0x18] sm:$0xff] %vm334_vm2, %v333_v23 }
  0xed   : > { %335 = vst.msk [vmem:[%s198_s16] sm:$0xff] %vm334_vm2, %v330_v24  ;;  %337 = vst.msk [vmem:[%s198_s16 + $0x10] sm:$0xff] %vm334_vm2, %v332_v25 }
  0xee PF: > { %s13_s14 = sadd.s32 1, %s499_s14   ;;  %s591_s12 = smov %s495_s13 }
  0xef   : > { %p10_p5 = scmp.ge.s32.totalorder %s13_s14, 4   ;;  %s592_s13 = smov %s594_s15 }
  0xf1   :  { %12 = sbr.rel (!%p10_p5) target bundleno = 2 (0x2), region = 62 }

</bundles_post_ra>
